<compile_context>
chip_gen: v7x
topology: tpu7x:2x2x1
jax: 0.10.0
libtpu: 0.0.40
codegen_flags: <defaults>
</compile_context>

<pallas_src>
import functools

import jax
import jax.numpy as jnp
import numpy as np
from jax.experimental import pallas as pl
from jax.experimental.pallas import tpu as pltpu


def _round_up(n, m):
    return ((n + m - 1) // m) * m


# ----------------------------------------------------------------------------
# Encoder stage 1: XW0 = X @ W0   (row-tiled; O(N*D*H1), tiny)
# ----------------------------------------------------------------------------
def xw_kernel(x_ref, w0_ref, xw_ref):
    xw_ref[...] = jnp.dot(x_ref[...], w0_ref[...],
                          preferred_element_type=jnp.float32)


# ----------------------------------------------------------------------------
# Encoder stage 2: hcat = relu(adj @ XW0) @ W_cat   (row blocks of adj)
#   W_cat = [W_mu | W_sigma]  ->  one projection + one adj-side matmul later
# ----------------------------------------------------------------------------
def hcat_kernel(adj_ref, xw_ref, wcat_ref, hcat_ref):
    hidden = jnp.maximum(
        jnp.dot(adj_ref[...], xw_ref[...], preferred_element_type=jnp.float32),
        0.0)
    hcat_ref[...] = jnp.dot(hidden, wcat_ref[...],
                            preferred_element_type=jnp.float32)


# ----------------------------------------------------------------------------
# Encoder stage 3: [mean|logstd] = adj @ hcat ; Z = noise * exp(logstd) + mean
# ----------------------------------------------------------------------------
def z_kernel(adj_ref, hcat_ref, noise_ref, z_ref, *, h2):
    out = jnp.dot(adj_ref[...], hcat_ref[...],
                  preferred_element_type=jnp.float32)
    mean = out[:, :h2]
    logstd = out[:, h2:]
    # padded rows: adj rows / noise rows are zero -> mean=logstd=0 -> Z=0
    z_ref[...] = noise_ref[...] * jnp.exp(logstd) + mean


# ----------------------------------------------------------------------------
# Decoder: one (TM, TN) tile of A_pred = sigmoid(Z @ Z.T)
# ----------------------------------------------------------------------------
def decoder_kernel(z_row_ref, z_col_ref, a_ref):
    logits = jax.lax.dot_general(
        z_row_ref[...], z_col_ref[...],
        dimension_numbers=(((1,), (1,)), ((), ())),
        preferred_element_type=jnp.float32)
    # sigmoid(x) = 0.5 * (1 + tanh(x/2)) -> a single EUP transcendental/elem
    a_ref[...] = (0.5 * (jnp.tanh(0.5 * logits) + 1.0)).astype(a_ref.dtype)


def vgae_forward(x, adj, w0, w_mu, w_sigma, noise, *, out_dtype=jnp.float32):
    n, d = x.shape
    h1 = w0.shape[1]
    h2 = w_mu.shape[1]

    # Fuse the mean / logstd projection weights: one adj-side matmul not two.
    w_cat = jnp.concatenate([w_mu, w_sigma], axis=1)          # [H1, 2*H2]

    # ---------------- encoder padding / tiling ---------------------------
    n_pad = _round_up(n, 128)
    if n_pad != n:
        x = jnp.pad(x, ((0, n_pad - n), (0, 0)))
        adj = jnp.pad(adj, ((0, n_pad - n), (0, n_pad - n)))
        noise = jnp.pad(noise, ((0, n_pad - n), (0, 0)))

    # adj row tile: largest of {512, 256, 128} that divides n_pad while keeping
    # the double-buffered adj block under ~16 MiB (safe on v5e/v6e/v7x).
    enc_tm = 128
    for cand in (512, 256):
        if n_pad % cand == 0 and cand * n_pad * 4 * 2 <= (16 << 20):
            enc_tm = cand
            break
    enc_grid = (n_pad // enc_tm,)

    enc_params = pltpu.CompilerParams(
        dimension_semantics=("parallel",),
        vmem_limit_bytes=int(48 * 1024 * 1024))

    def full2(a):
        return pl.BlockSpec(a.shape, lambda i: (0, 0))

    # ---- stage 1: XW0 = X @ W0 ------------------------------------------
    xw = pl.pallas_call(
        xw_kernel,
        out_shape=jax.ShapeDtypeStruct((n_pad, h1), jnp.float32),
        grid_spec=pltpu.PrefetchScalarGridSpec(
            num_scalar_prefetch=0, grid=enc_grid,
            in_specs=[pl.BlockSpec((enc_tm, d), lambda i: (i, 0)),
                      full2(w0)],
            out_specs=pl.BlockSpec((enc_tm, h1), lambda i: (i, 0))),
        compiler_params=enc_params,
    )(x, w0)

    # ---- stage 2: hcat = relu(adj @ XW0) @ W_cat ------------------------
    hcat = pl.pallas_call(
        hcat_kernel,
        out_shape=jax.ShapeDtypeStruct((n_pad, 2 * h2), jnp.float32),
        grid_spec=pltpu.PrefetchScalarGridSpec(
            num_scalar_prefetch=0, grid=enc_grid,
            in_specs=[pl.BlockSpec((enc_tm, n_pad), lambda i: (i, 0)),
                      pl.BlockSpec((n_pad, h1), lambda i: (0, 0)),
                      full2(w_cat)],
            out_specs=pl.BlockSpec((enc_tm, 2 * h2), lambda i: (i, 0))),
        compiler_params=enc_params,
    )(adj, xw, w_cat)

    # ---- stage 3: Z = noise * exp(logstd) + mean ------------------------
    z = pl.pallas_call(
        functools.partial(z_kernel, h2=h2),
        out_shape=jax.ShapeDtypeStruct((n_pad, h2), jnp.float32),
        grid_spec=pltpu.PrefetchScalarGridSpec(
            num_scalar_prefetch=0, grid=enc_grid,
            in_specs=[pl.BlockSpec((enc_tm, n_pad), lambda i: (i, 0)),
                      pl.BlockSpec((n_pad, 2 * h2), lambda i: (0, 0)),
                      pl.BlockSpec((enc_tm, h2), lambda i: (i, 0))],
            out_specs=pl.BlockSpec((enc_tm, h2), lambda i: (i, 0))),
        compiler_params=enc_params,
    )(adj, hcat, noise)

    # ---------------- decoder: A_pred = sigmoid(Z @ Z.T) -----------------
    # Decoder padding is decoupled from the encoder padding: pad Z rows up to
    # the decoder tile so the lane-dense >=512 output tile path always holds.
    n_dec = _round_up(n, 512)
    dec_tile = 1024 if (n_dec % 1024 == 0) else 512
    if n_dec != n_pad:
        z = jnp.pad(z, ((0, n_dec - n_pad), (0, 0)))   # cheap: only H2 cols
    dec_grid = (n_dec // dec_tile, n_dec // dec_tile)

    cost = pl.CostEstimate(
        flops=2 * n_dec * n_dec * h2,
        transcendentals=n_dec * n_dec,
        bytes_accessed=4 * n_dec * n_dec + 2 * 4 * n_dec * h2)

    a_pad = pl.pallas_call(
        decoder_kernel,
        out_shape=jax.ShapeDtypeStruct((n_dec, n_dec), out_dtype),
        grid_spec=pltpu.PrefetchScalarGridSpec(
            num_scalar_prefetch=0, grid=dec_grid,
            in_specs=[
                pl.BlockSpec((dec_tile, h2), lambda i, j: (i, 0)),  # Z rows
                pl.BlockSpec((dec_tile, h2), lambda i, j: (j, 0)),  # Z cols
            ],
            out_specs=pl.BlockSpec((dec_tile, dec_tile), lambda i, j: (i, j))),
        compiler_params=pltpu.CompilerParams(
            dimension_semantics=("parallel", "parallel")),
        cost_estimate=cost,
    )(z, z)

    # Padded Z rows are exactly zero -> padded A_pred region is 0.5; trim it.
    if n_dec != n:
        a_pad = a_pad[:n, :n]
    return a_pad


def glorot_init(key, input_dim, output_dim):
    """Deterministic equivalent of the torch glorot_init (uniform in +-range)."""
    init_range = np.sqrt(6.0 / (input_dim + output_dim))
    return jax.random.uniform(
        key, (input_dim, output_dim), dtype=jnp.float32,
        minval=-init_range, maxval=init_range)


def reference_forward(x, adj, w0, w_mu, w_sigma, noise):
    hidden = jax.nn.relu(adj @ (x @ w0))
    mean = adj @ (hidden @ w_mu)
    logstd = adj @ (hidden @ w_sigma)
    z = noise * jnp.exp(logstd) + mean
    return jax.nn.sigmoid(z @ z.T)


if __name__ == "__main__":
    # Small, module-consistent shapes: N nodes, input_dim, hidden1, hidden2.
    N, INPUT_DIM, HIDDEN1, HIDDEN2 = 16, 32, 32, 16

    key = jax.random.PRNGKey(0)
    k_x, k_adj, k_w0, k_wmu, k_wsig, k_noise = jax.random.split(key, 6)

    # Node features.
    x = jax.random.normal(k_x, (N, INPUT_DIM), dtype=jnp.float32)

    # Symmetric adjacency with self loops, row-normalized (dense, deterministic).
    a_raw = (jax.random.uniform(k_adj, (N, N)) > 0.7).astype(jnp.float32)
    a_sym = jnp.clip(a_raw + a_raw.T, 0.0, 1.0) + jnp.eye(N, dtype=jnp.float32)
    deg = jnp.sum(a_sym, axis=1, keepdims=True)
    adj = a_sym / deg

    # Glorot-initialized GCN weights (shapes from the module __init__).
    w0 = glorot_init(k_w0, INPUT_DIM, HIDDEN1)
    w_mu = glorot_init(k_wmu, HIDDEN1, HIDDEN2)
    w_sigma = glorot_init(k_wsig, HIDDEN1, HIDDEN2)

    # Reparameterization noise (torch.randn(N, hidden2) equivalent, fixed key).
    noise = jax.random.normal(k_noise, (N, HIDDEN2), dtype=jnp.float32)

    a_pred = vgae_forward(x, adj, w0, w_mu, w_sigma, noise)
    a_pred = jax.block_until_ready(a_pred)

    a_ref = reference_forward(x, adj, w0, w_mu, w_sigma, noise)
    np.testing.assert_allclose(np.asarray(a_pred), np.asarray(a_ref),
                               rtol=1e-5, atol=1e-5)

    print("KERNEL_OK")
</pallas_src>

<mosaic_0001>
module attributes {stable_mosaic.version = 11 : i64} {
  func.func @xw_kernel(%arg0: i32, %arg1: memref<128x32xf32, #tpu.memory_space<vmem>>, %arg2: memref<32x32xf32, #tpu.memory_space<vmem>>, %arg3: memref<128x32xf32, #tpu.memory_space<vmem>>) attributes {dimension_semantics = [#tpu.dimension_semantics<parallel>], iteration_bounds = array<i64: 1>, scalar_prefetch = 0 : i64, scratch_operands = 0 : i64, tpu.core_type = #tpu.core_type<tc>, window_params = [{transform_indices = @transform_0, window_bounds = array<i64: 128, 32>}, {pipeline_mode = #tpu.pipeline_mode<synchronous>, transform_indices = @transform_1, window_bounds = array<i64: 32, 32>}, {transform_indices = @transform_2, window_bounds = array<i64: 128, 32>}]} {
    %c0 = arith.constant 0 : index
    %c0_0 = arith.constant 0 : index
    %0 = vector.load %arg1[%c0, %c0_0] : memref<128x32xf32, #tpu.memory_space<vmem>>, vector<128x32xf32>
    %c0_1 = arith.constant 0 : index
    %c0_2 = arith.constant 0 : index
    %1 = vector.load %arg2[%c0_1, %c0_2] : memref<32x32xf32, #tpu.memory_space<vmem>>, vector<32x32xf32>
    %cst = arith.constant dense<0.000000e+00> : vector<128x32xf32>
    %2 = tpu.matmul %0, %1, %cst {dimension_numbers = #tpu.dot_dimension_numbers<[1], [0], [0], [1], [0, 0, 1, 1], [], []>} : vector<128x32xf32>, vector<32x32xf32>, vector<128x32xf32> -> vector<128x32xf32>
    %c0_3 = arith.constant 0 : index
    %c0_4 = arith.constant 0 : index
    %3 = vector.load %arg3[%c0_3, %c0_4] : memref<128x32xf32, #tpu.memory_space<vmem>>, vector<128x32xf32>
    tpu.vector_store %arg3[%c0_3, %c0_4], %2 {strides = array<i32>} : memref<128x32xf32, #tpu.memory_space<vmem>>, vector<128x32xf32>,
    return
  }
  func.func @transform_0(%arg0: i32) -> (i32, i32) {
    %c0_i32 = arith.constant 0 : i32
    %c0_i32_0 = arith.constant 0 : i32
    return %arg0, %c0_i32 : i32, i32
  }
  func.func @transform_1(%arg0: i32) -> (i32, i32) {
    %c0_i32 = arith.constant 0 : i32
    %c0_i32_0 = arith.constant 0 : i32
    %c0_i32_1 = arith.constant 0 : i32
    return %c0_i32, %c0_i32_0 : i32, i32
  }
  func.func @transform_2(%arg0: i32) -> (i32, i32) {
    %c0_i32 = arith.constant 0 : i32
    %c0_i32_0 = arith.constant 0 : i32
    return %arg0, %c0_i32 : i32, i32
  }
}

</mosaic_0001>

<bundles_post_ra>
// kernel: tpu_custom_call.1
= control target key start
LH: loop header
LB: loop body
LE: loop exit
PB: predicated region body
PF: predicated region fallthrough
CT: control target
= control target key end

     0   :  { %vm31_vm0 = vcmask 261120   ;;  %s480_s1 = inlined_call_operand.vmem [shape: f32[32,32], index: 1, kind: input, shape index: {}]   ;;  %s481_s0 = inlined_call_operand.vmem [shape: f32[128,32], index: 0, kind: input, shape index: {}]   ;;  %s482_s2 = inlined_call_operand.vmem [shape: f32[128,32], index: 2, kind: output, shape index: {}]  }
   0x1   :  { %v27_v0 = vld [vmem:[%s480_s1] sm:$0xff]  ;;  %v28_v1 = vld [vmem:[%s480_s1 + $0x8] sm:$0xff]  ;;  %v29_v2 = vld [vmem:[%s480_s1 + $0x10] sm:$0xff] }
   0x2   :  { %v313_v3 = vpack.c.bf16 %v28_v1, %v27_v0  ;;  %v30_v4 = vld [vmem:[%s480_s1 + $0x18] sm:$0xff]  ;;  %v11_v5 = vld [vmem:[%s481_s0] sm:$0xff]  ;;  %v12_v8 = vld [vmem:[%s481_s0 + $0x8] sm:$0xff] }
   0x3   :  { %v19_v6 = vld [vmem:[%s481_s0 + $0x40] sm:$0xff]  ;;  %v317_v7 = vpack.c.bf16 %v30_v4, %v29_v2  ;;  %289 = vmatprep.mubr.msk.f32.mxu0 %vm31_vm0, %v11_v5  ;;  %v20_v9 = vld [vmem:[%s481_s0 + $0x48] sm:$0xff]  ;;  %v13_v10 = vld [vmem:[%s481_s0 + $0x10] sm:$0xff] }
   0x4   :  { %301 = vmatprep.mubr.msk.f32.mxu1 %vm31_vm0, %v19_v6  ;;  %314 = vmatprep.subr.bf16.mxu0 %v313_v3  ;;  %v21_v11 = vld [vmem:[%s481_s0 + $0x50] sm:$0xff]  ;;  %v14_v12 = vld [vmem:[%s481_s0 + $0x18] sm:$0xff]  ;;  %v15_v14 = vld [vmem:[%s481_s0 + $0x20] sm:$0xff] }
   0x5   :  { %321 = vmatprep.subr.bf16.mxu1 %v313_v3  ;;  %316 = vmatpush3.bf16.msra.mxu0 %v313_v3  ;;  %v22_v13 = vld [vmem:[%s481_s0 + $0x58] sm:$0xff]  ;;  %v23_v15 = vld [vmem:[%s481_s0 + $0x60] sm:$0xff]  ;;  %v16_v16 = vld [vmem:[%s481_s0 + $0x28] sm:$0xff] }
   0x6   :  { %323 = vmatpush3.bf16.msra.mxu1 %v313_v3  ;;  %318 = vmatprep.subr.bf16.mxu0 %v317_v7  ;;  %v24_v17 = vld [vmem:[%s481_s0 + $0x68] sm:$0xff]  ;;  %v17_v18 = vld [vmem:[%s481_s0 + $0x30] sm:$0xff]  ;;  %v18_v20 = vld [vmem:[%s481_s0 + $0x38] sm:$0xff] }
   0x7   :  { %322 = vmatprep.subr.bf16.mxu1 %v317_v7  ;;  %v25_v19 = vld [vmem:[%s481_s0 + $0x70] sm:$0xff]  ;;  %v26_v21 = vld [vmem:[%s481_s0 + $0x78] sm:$0xff] }
   0x9   :  { %320 = vmatpush3.bf16.msra.mxu0 %v317_v7 }
   0xa   :  { %324 = vmatpush3.bf16.msra.mxu1 %v317_v7 }
   0xc   :  { %290 = vmatmul.mubr.msk.f32.vlgmr.msra.gmra.mrb[0].mxu0 %vm31_vm0, %v12_v8 }
   0xd   :  { %302 = vmatmul.mubr.msk.f32.vlgmr.msra.gmra.mrb[0].mxu1 %vm31_vm0, %v20_v9  ;;  %292 = vmatprep.mubr.msk.f32.mxu0 %vm31_vm0, %v13_v10 }
   0xe   :  { %304 = vmatprep.mubr.msk.f32.mxu1 %vm31_vm0, %v21_v11 }
  0x10   :  { %293 = vmatmul.mubr.msk.f32.gmra.mrb[2].mxu0 %vm31_vm0, %v14_v12 }
  0x11   :  { %305 = vmatmul.mubr.msk.f32.gmra.mrb[2].mxu1 %vm31_vm0, %v22_v13  ;;  %295 = vmatprep.mubr.msk.f32.mxu0 %vm31_vm0, %v15_v14 }
  0x12   :  { %307 = vmatprep.mubr.msk.f32.mxu1 %vm31_vm0, %v23_v15 }
  0x14   :  { %296 = vmatmul.mubr.msk.f32.gmra.mrb[4].mxu0 %vm31_vm0, %v16_v16 }
  0x15   :  { %308 = vmatmul.mubr.msk.f32.gmra.mrb[4].mxu1 %vm31_vm0, %v24_v17  ;;  %298 = vmatprep.mubr.msk.f32.mxu0 %vm31_vm0, %v17_v18 }
  0x16   :  { %310 = vmatprep.mubr.msk.f32.mxu1 %vm31_vm0, %v25_v19 }
  0x18   :  { %299 = vmatmul.mubr.msk.f32.gmra.mrb[6].mxu0 %vm31_vm0, %v18_v20 }
  0x19   :  { %311 = vmatmul.mubr.msk.f32.gmra.mrb[6].mxu1 %vm31_vm0, %v26_v21 }
  0xdf   :  { %v291_v22 = vpop.f32.mrb[0].mxu0 }
  0xe0   :  { %v303_v23 = vpop.f32.mrb[0].mxu1  ;;  %226 = vst.msk [vmem:[%s482_s2 + $0x8] sm:$0xff] %vm31_vm0, %v291_v22  ;;  %v146_v24 = vpop.f32.mrb[1].mxu0 }
  0xe1   :  { %234 = vst.msk [vmem:[%s482_s2 + $0x48] sm:$0xff] %vm31_vm0, %v303_v23  ;;  %v186_v25 = vpop.f32.mrb[1].mxu1  ;;  %225 = vst.msk [vmem:[%s482_s2] sm:$0xff] %vm31_vm0, %v146_v24 }
  0xe2   :  { %233 = vst.msk [vmem:[%s482_s2 + $0x40] sm:$0xff] %vm31_vm0, %v186_v25 }
  0xe3   :  { %v294_v26 = vpop.f32.mrb[2].mxu0 }
  0xe4   :  { %v306_v27 = vpop.f32.mrb[2].mxu1  ;;  %228 = vst.msk [vmem:[%s482_s2 + $0x18] sm:$0xff] %vm31_vm0, %v294_v26  ;;  %v156_v28 = vpop.f32.mrb[3].mxu0 }
  0xe5   :  { %236 = vst.msk [vmem:[%s482_s2 + $0x58] sm:$0xff] %vm31_vm0, %v306_v27  ;;  %v196_v29 = vpop.f32.mrb[3].mxu1  ;;  %227 = vst.msk [vmem:[%s482_s2 + $0x10] sm:$0xff] %vm31_vm0, %v156_v28 }
  0xe6   :  { %235 = vst.msk [vmem:[%s482_s2 + $0x50] sm:$0xff] %vm31_vm0, %v196_v29 }
  0xe7   :  { %v297_v30 = vpop.f32.mrb[4].mxu0 }
  0xe8   :  { %v309_v31 = vpop.f32.mrb[4].mxu1  ;;  %230 = vst.msk [vmem:[%s482_s2 + $0x28] sm:$0xff] %vm31_vm0, %v297_v30  ;;  %v166_v32 = vpop.f32.mrb[5].mxu0 }
  0xe9   :  { %238 = vst.msk [vmem:[%s482_s2 + $0x68] sm:$0xff] %vm31_vm0, %v309_v31  ;;  %v206_v33 = vpop.f32.mrb[5].mxu1  ;;  %229 = vst.msk [vmem:[%s482_s2 + $0x20] sm:$0xff] %vm31_vm0, %v166_v32 }
  0xea   :  { %237 = vst.msk [vmem:[%s482_s2 + $0x60] sm:$0xff] %vm31_vm0, %v206_v33 }
  0xeb   :  { %v300_v34 = vpop.f32.mrb[6].mxu0 }
  0xec   :  { %v312_v35 = vpop.f32.mrb[6].mxu1  ;;  %232 = vst.msk [vmem:[%s482_s2 + $0x38] sm:$0xff] %vm31_vm0, %v300_v34  ;;  %v176_v36 = vpop.f32.mrb[7].mxu0 }
  0xed   :  { %240 = vst.msk [vmem:[%s482_s2 + $0x78] sm:$0xff] %vm31_vm0, %v312_v35  ;;  %v216_v37 = vpop.f32.mrb[7].mxu1  ;;  %231 = vst.msk [vmem:[%s482_s2 + $0x30] sm:$0xff] %vm31_vm0, %v176_v36 }
  0xee   :  { %239 = vst.msk [vmem:[%s482_s2 + $0x70] sm:$0xff] %vm31_vm0, %v216_v37 }

</bundles_post_ra>
